<compile_context>
chip_gen: v5e
topology: v5e:2x2
jax: 0.10.0
libtpu: 0.0.40
codegen_flags: <defaults>
</compile_context>

<pallas_src>
import jax
import jax.numpy as jnp
from jax.experimental import pallas as pl
from jax.experimental.pallas import tpu as pltpu

EMB_DIM = 64                      # synthetic sentence-embedding dimension
N_SENT = 6                        # module concatenates 6 sentence embeddings
D_IN = EMB_DIM * N_SENT           # 384  (multiple of 128)
H1, H2, H3 = 512, 256, 128        # all multiples of 128

_MAX_TB = 1024                    # batch-tile cap (v5e scoped-VMEM headroom)


def _round_up(n, m):
    return (n + m - 1) // m * m


def _cdiv(a, b):
    return -(-a // b)


def _choose_tb(bp):
    """Pick the batch tile.  bp is already a multiple of 8."""
    if bp <= 32:
        return bp
    # >= 2 grid steps (v7x megacore), tiles as equal as possible (minimal
    # padded-row waste on the last partial tile), capped at 1024 rows.
    n_tiles = max(2, _cdiv(bp, _MAX_TB))
    return min(_MAX_TB, _round_up(_cdiv(bp, n_tiles), 8))


def _mlp_kernel(x_ref, w1_ref, b1_ref, w2_ref, b2_ref,
                w3_ref, b3_ref, w4_ref, b4_ref, o_ref):
    # f32 -> bf16 cast inside the kernel (VPU; hidden under the MXU work)
    # instead of a separate wrapper-side XLA cast pass over HBM.
    x = x_ref[...].astype(jnp.bfloat16)

    # Layer 1: (tb, 384) @ (384, 512) -> f32 acc, +b1, ReLU
    h = jnp.dot(x, w1_ref[...], preferred_element_type=jnp.float32)
    h = jnp.maximum(h + b1_ref[...], 0.0)
    # Layer 2
    h = jnp.dot(h.astype(jnp.bfloat16), w2_ref[...],
                preferred_element_type=jnp.float32)
    h = jnp.maximum(h + b2_ref[...], 0.0)
    # Layer 3
    h = jnp.dot(h.astype(jnp.bfloat16), w3_ref[...],
                preferred_element_type=jnp.float32)
    h = jnp.maximum(h + b3_ref[...], 0.0)

    # Final 128 -> 1 projection: VPU multiply + XLU lane reduce (no 128x
    # zero-padded MXU matmul), result already in the (tb, 1) block layout.
    out = jnp.sum(h * w4_ref[...], axis=-1, keepdims=True) + b4_ref[...]
    o_ref[...] = out.astype(o_ref.dtype)


def sbert_regression_mlp(x, params):
    """x: (B, D_IN) float32 combined SBERT features.  Returns (B, 1) float32."""
    w1, b1, w2, b2, w3, b3, w4, b4 = params
    B = x.shape[0]
    assert x.shape[1] == D_IN

    # Only pad rows to a sublane multiple when necessary (no unconditional
    # pad/cast pass); the last partial batch tile is handled by Pallas.
    Bp = _round_up(B, 8)
    if Bp != B:
        x = jnp.pad(x, ((0, Bp - B), (0, 0)))

    tb = _choose_tb(Bp)
    grid = (_cdiv(Bp, tb),)

    def const_spec(shape):
        # Same block every grid step + single buffer -> fetched once,
        # VMEM-resident for the whole kernel.
        return pl.BlockSpec(shape, lambda i: (0, 0),
                            pipeline_mode=pl.Buffered(1))

    out = pl.pallas_call(
        _mlp_kernel,
        out_shape=jax.ShapeDtypeStruct((Bp, 1), jnp.float32),
        grid=grid,
        in_specs=[
            pl.BlockSpec((tb, D_IN), lambda i: (i, 0)),     # x tile (f32)
            const_spec((D_IN, H1)), const_spec((1, H1)),
            const_spec((H1, H2)), const_spec((1, H2)),
            const_spec((H2, H3)), const_spec((1, H3)),
            const_spec((1, H3)), const_spec((1, 1)),        # w4 row, b4
        ],
        out_specs=pl.BlockSpec((tb, 1), lambda i: (i, 0)),
        compiler_params=pltpu.CompilerParams(
            dimension_semantics=("parallel",)),
    )(x, w1, b1, w2, b2, w3, b3, w4, b4)

    return out if Bp == B else out[:B]


def init_params(key):
    ks = jax.random.split(key, 8)

    def linear(kw, kb, fan_in, fan_out):
        # PyTorch nn.Linear default init: U(-1/sqrt(fan_in), 1/sqrt(fan_in))
        bound = 1.0 / jnp.sqrt(fan_in)
        w = jax.random.uniform(kw, (fan_in, fan_out), jnp.float32, -bound, bound)
        b = jax.random.uniform(kb, (1, fan_out), jnp.float32, -bound, bound)
        return w, b

    w1, b1 = linear(ks[0], ks[1], D_IN, H1)
    w2, b2 = linear(ks[2], ks[3], H1, H2)
    w3, b3 = linear(ks[4], ks[5], H2, H3)
    w4, b4 = linear(ks[6], ks[7], H3, 1)

    # Final projection kept as an f32 row vector (1, H3) and scalar bias (1, 1)
    # for the VPU multiply + lane-reduce in the kernel.
    w4_row = w4.reshape(1, H3)
    b4_sc = b4.reshape(1, 1)

    # MXU weights in bf16 (half the HBM/VMEM bytes); biases stay f32.
    return (w1.astype(jnp.bfloat16), b1,
            w2.astype(jnp.bfloat16), b2,
            w3.astype(jnp.bfloat16), b3,
            w4_row, b4_sc)


def reference_mlp(x, params):
    """Pure-JAX reference mirroring the kernel's bf16 matmul inputs / f32 acc."""
    w1, b1, w2, b2, w3, b3, w4, b4 = params

    def mm(a, w):
        return jnp.dot(a.astype(jnp.bfloat16).astype(jnp.float32),
                       w.astype(jnp.float32))

    h = jnp.maximum(mm(x, w1) + b1, 0.0)
    h = jnp.maximum(mm(h, w2) + b2, 0.0)
    h = jnp.maximum(mm(h, w3) + b3, 0.0)
    return jnp.sum(h * w4, axis=-1, keepdims=True) + b4


if __name__ == "__main__":
    key = jax.random.PRNGKey(0)
    k_param, k_emb = jax.random.split(key)

    params = init_params(k_param)

    # Simulate sbert.encode for a batch of 2 sentence-lists, each with 6
    # sentences.  cat(dim=1) of 6 x (1, EMB_DIM) -> (1, 6*EMB_DIM) per list.
    B = 2
    embeddings = jax.random.normal(k_emb, (B, N_SENT, EMB_DIM), jnp.float32)
    combined_features = embeddings.reshape(B, D_IN)   # torch.cat(dim=1)

    out = sbert_regression_mlp(combined_features, params)
    out = jax.block_until_ready(out)

    ref = reference_mlp(combined_features, params)
    assert out.shape == (B, 1)
    assert jnp.allclose(out, ref, atol=2e-2, rtol=2e-2), (out, ref)

    print("KERNEL_OK")
</pallas_src>

<mosaic_0001>
module attributes {stable_mosaic.version = 11 : i64} {
  func.func @_mlp_kernel(%arg0: i32, %arg1: memref<8x384xf32, #tpu.memory_space<vmem>>, %arg2: memref<384x512xbf16, #tpu.memory_space<vmem>>, %arg3: memref<1x512xf32, #tpu.memory_space<vmem>>, %arg4: memref<512x256xbf16, #tpu.memory_space<vmem>>, %arg5: memref<1x256xf32, #tpu.memory_space<vmem>>, %arg6: memref<256x128xbf16, #tpu.memory_space<vmem>>, %arg7: memref<1x128xf32, #tpu.memory_space<vmem>>, %arg8: memref<1x128xf32, #tpu.memory_space<vmem>>, %arg9: memref<1x1xf32, #tpu.memory_space<vmem>>, %arg10: memref<8x1xf32, #tpu.memory_space<vmem>>) attributes {dimension_semantics = [#tpu.dimension_semantics<parallel>], iteration_bounds = array<i64: 1>, scalar_prefetch = 0 : i64, scratch_operands = 0 : i64, tpu.core_type = #tpu.core_type<tc>, window_params = [{transform_indices = @transform_0, window_bounds = array<i64: 8, 384>}, {pipeline_mode = #tpu.pipeline_mode<synchronous>, transform_indices = @transform_1, window_bounds = array<i64: 384, 512>}, {pipeline_mode = #tpu.pipeline_mode<synchronous>, transform_indices = @transform_2, window_bounds = array<i64: 1, 512>}, {pipeline_mode = #tpu.pipeline_mode<synchronous>, transform_indices = @transform_3, window_bounds = array<i64: 512, 256>}, {pipeline_mode = #tpu.pipeline_mode<synchronous>, transform_indices = @transform_4, window_bounds = array<i64: 1, 256>}, {pipeline_mode = #tpu.pipeline_mode<synchronous>, transform_indices = @transform_5, window_bounds = array<i64: 256, 128>}, {pipeline_mode = #tpu.pipeline_mode<synchronous>, transform_indices = @transform_6, window_bounds = array<i64: 1, 128>}, {pipeline_mode = #tpu.pipeline_mode<synchronous>, transform_indices = @transform_7, window_bounds = array<i64: 1, 128>}, {pipeline_mode = #tpu.pipeline_mode<synchronous>, transform_indices = @transform_8, window_bounds = array<i64: 1, 1>}, {transform_indices = @transform_9, window_bounds = array<i64: 8, 1>}]} {
    %c0 = arith.constant 0 : index
    %c0_0 = arith.constant 0 : index
    %0 = vector.load %arg1[%c0, %c0_0] : memref<8x384xf32, #tpu.memory_space<vmem>>, vector<8x384xf32>
    %1 = arith.truncf %0 : vector<8x384xf32> to vector<8x384xbf16>
    %c0_1 = arith.constant 0 : index
    %c0_2 = arith.constant 0 : index
    %2 = vector.load %arg2[%c0_1, %c0_2] : memref<384x512xbf16, #tpu.memory_space<vmem>>, vector<384x512xbf16>
    %cst = arith.constant dense<0.000000e+00> : vector<8x512xf32>
    %3 = tpu.matmul %1, %2, %cst {dimension_numbers = #tpu.dot_dimension_numbers<[1], [0], [0], [1], [0, 0, 1, 1], [], []>} : vector<8x384xbf16>, vector<384x512xbf16>, vector<8x512xf32> -> vector<8x512xf32>
    %c0_3 = arith.constant 0 : index
    %c0_4 = arith.constant 0 : index
    %4 = vector.load %arg3[%c0_3, %c0_4] : memref<1x512xf32, #tpu.memory_space<vmem>>, vector<1x512xf32>
    %5 = vector.broadcast %4 : vector<1x512xf32> to vector<8x512xf32>
    %6 = arith.addf %3, %5 : vector<8x512xf32>
    %cst_5 = arith.constant 0.000000e+00 : f32
    %7 = vector.broadcast %cst_5 : f32 to vector<8x512xf32>
    %8 = arith.maximumf %6, %7 : vector<8x512xf32>
    %9 = arith.truncf %8 : vector<8x512xf32> to vector<8x512xbf16>
    %c0_6 = arith.constant 0 : index
    %c0_7 = arith.constant 0 : index
    %10 = vector.load %arg4[%c0_6, %c0_7] : memref<512x256xbf16, #tpu.memory_space<vmem>>, vector<512x256xbf16>
    %cst_8 = arith.constant dense<0.000000e+00> : vector<8x256xf32>
    %11 = tpu.matmul %9, %10, %cst_8 {dimension_numbers = #tpu.dot_dimension_numbers<[1], [0], [0], [1], [0, 0, 1, 1], [], []>} : vector<8x512xbf16>, vector<512x256xbf16>, vector<8x256xf32> -> vector<8x256xf32>
    %c0_9 = arith.constant 0 : index
    %c0_10 = arith.constant 0 : index
    %12 = vector.load %arg5[%c0_9, %c0_10] : memref<1x256xf32, #tpu.memory_space<vmem>>, vector<1x256xf32>
    %13 = vector.broadcast %12 : vector<1x256xf32> to vector<8x256xf32>
    %14 = arith.addf %11, %13 : vector<8x256xf32>
    %cst_11 = arith.constant 0.000000e+00 : f32
    %15 = vector.broadcast %cst_11 : f32 to vector<8x256xf32>
    %16 = arith.maximumf %14, %15 : vector<8x256xf32>
    %17 = arith.truncf %16 : vector<8x256xf32> to vector<8x256xbf16>
    %c0_12 = arith.constant 0 : index
    %c0_13 = arith.constant 0 : index
    %18 = vector.load %arg6[%c0_12, %c0_13] : memref<256x128xbf16, #tpu.memory_space<vmem>>, vector<256x128xbf16>
    %cst_14 = arith.constant dense<0.000000e+00> : vector<8x128xf32>
    %19 = tpu.matmul %17, %18, %cst_14 {dimension_numbers = #tpu.dot_dimension_numbers<[1], [0], [0], [1], [0, 0, 1, 1], [], []>} : vector<8x256xbf16>, vector<256x128xbf16>, vector<8x128xf32> -> vector<8x128xf32>
    %c0_15 = arith.constant 0 : index
    %c0_16 = arith.constant 0 : index
    %20 = vector.load %arg7[%c0_15, %c0_16] : memref<1x128xf32, #tpu.memory_space<vmem>>, vector<1x128xf32>
    %21 = vector.broadcast %20 : vector<1x128xf32> to vector<8x128xf32>
    %22 = arith.addf %19, %21 : vector<8x128xf32>
    %cst_17 = arith.constant 0.000000e+00 : f32
    %23 = vector.broadcast %cst_17 : f32 to vector<8x128xf32>
    %24 = arith.maximumf %22, %23 : vector<8x128xf32>
    %c0_18 = arith.constant 0 : index
    %c0_19 = arith.constant 0 : index
    %25 = vector.load %arg8[%c0_18, %c0_19] : memref<1x128xf32, #tpu.memory_space<vmem>>, vector<1x128xf32>
    %26 = vector.broadcast %25 : vector<1x128xf32> to vector<8x128xf32>
    %27 = arith.mulf %24, %26 : vector<8x128xf32>
    %cst_20 = arith.constant dense<0.000000e+00> : vector<8xf32>
    %28 = vector.multi_reduction <add>, %27, %cst_20 [1] : vector<8x128xf32> to vector<8xf32>
    %29 = vector.shape_cast %28 : vector<8xf32> to vector<8x1xf32>
    %c0_21 = arith.constant 0 : index
    %c0_22 = arith.constant 0 : index
    %30 = vector.load %arg9[%c0_21, %c0_22] : memref<1x1xf32, #tpu.memory_space<vmem>>, vector<1x1xf32>
    %31 = vector.broadcast %30 : vector<1x1xf32> to vector<8x1xf32>
    %32 = arith.addf %29, %31 : vector<8x1xf32>
    %c0_23 = arith.constant 0 : index
    %c0_24 = arith.constant 0 : index
    %33 = vector.load %arg10[%c0_23, %c0_24] : memref<8x1xf32, #tpu.memory_space<vmem>>, vector<8x1xf32>
    tpu.vector_store %arg10[%c0_23, %c0_24], %32 {strides = array<i32>} : memref<8x1xf32, #tpu.memory_space<vmem>>, vector<8x1xf32>,
    return
  }
  func.func @transform_0(%arg0: i32) -> (i32, i32) {
    %c0_i32 = arith.constant 0 : i32
    %c0_i32_0 = arith.constant 0 : i32
    return %arg0, %c0_i32 : i32, i32
  }
  func.func @transform_1(%arg0: i32) -> (i32, i32) {
    %c0_i32 = arith.constant 0 : i32
    %c0_i32_0 = arith.constant 0 : i32
    %c0_i32_1 = arith.constant 0 : i32
    return %c0_i32, %c0_i32_0 : i32, i32
  }
  func.func @transform_2(%arg0: i32) -> (i32, i32) {
    %c0_i32 = arith.constant 0 : i32
    %c0_i32_0 = arith.constant 0 : i32
    %c0_i32_1 = arith.constant 0 : i32
    return %c0_i32, %c0_i32_0 : i32, i32
  }
  func.func @transform_3(%arg0: i32) -> (i32, i32) {
    %c0_i32 = arith.constant 0 : i32
    %c0_i32_0 = arith.constant 0 : i32
    %c0_i32_1 = arith.constant 0 : i32
    return %c0_i32, %c0_i32_0 : i32, i32
  }
  func.func @transform_4(%arg0: i32) -> (i32, i32) {
    %c0_i32 = arith.constant 0 : i32
    %c0_i32_0 = arith.constant 0 : i32
    %c0_i32_1 = arith.constant 0 : i32
    return %c0_i32, %c0_i32_0 : i32, i32
  }
  func.func @transform_5(%arg0: i32) -> (i32, i32) {
    %c0_i32 = arith.constant 0 : i32
    %c0_i32_0 = arith.constant 0 : i32
    %c0_i32_1 = arith.constant 0 : i32
    return %c0_i32, %c0_i32_0 : i32, i32
  }
  func.func @transform_6(%arg0: i32) -> (i32, i32) {
    %c0_i32 = arith.constant 0 : i32
    %c0_i32_0 = arith.constant 0 : i32
    %c0_i32_1 = arith.constant 0 : i32
    return %c0_i32, %c0_i32_0 : i32, i32
  }
  func.func @transform_7(%arg0: i32) -> (i32, i32) {
    %c0_i32 = arith.constant 0 : i32
    %c0_i32_0 = arith.constant 0 : i32
    %c0_i32_1 = arith.constant 0 : i32
    return %c0_i32, %c0_i32_0 : i32, i32
  }
  func.func @transform_8(%arg0: i32) -> (i32, i32) {
    %c0_i32 = arith.constant 0 : i32
    %c0_i32_0 = arith.constant 0 : i32
    %c0_i32_1 = arith.constant 0 : i32
    return %c0_i32, %c0_i32_0 : i32, i32
  }
  func.func @transform_9(%arg0: i32) -> (i32, i32) {
    %c0_i32 = arith.constant 0 : i32
    %c0_i32_0 = arith.constant 0 : i32
    return %arg0, %c0_i32 : i32, i32
  }
}

</mosaic_0001>

<bundles_post_ra>
// kernel: tpu_custom_call.1
= control target key start
LH: loop header
LB: loop body
LE: loop exit
PB: predicated region body
PF: predicated region fallthrough
CT: control target
= control target key end

     0   :  { %s2680_s0 = inlined_call_operand.hbm [shape: f32[8,384], index: 0, kind: input, shape index: {}]   ;;  %s2681_s1 = inlined_call_operand.hbm [shape: bf16[384,512], index: 1, kind: input, shape index: {}]   ;;  %s2682_s2 = inlined_call_operand.hbm [shape: f32[1,512], index: 2, kind: input, shape index: {}]   ;;  %s2683_s3 = inlined_call_operand.hbm [shape: bf16[512,256], index: 3, kind: input, shape index: {}]   ;;  %s2684_s4 = inlined_call_operand.vmem [shape: f32[1,256], index: 4, kind: input, shape index: {}]   ;;  %s2685_s5 = inlined_call_operand.hbm [shape: bf16[256,128], index: 5, kind: input, shape index: {}]   ;;  %s2686_s6 = inlined_call_operand.vmem [shape: f32[1,128], index: 6, kind: input, shape index: {}]   ;;  %s2687_s7 = inlined_call_operand.vmem [shape: f32[1,128], index: 7, kind: input, shape index: {}]   ;;  %s2688_s8 = inlined_call_operand.<no memory space> [shape: f32[1,1], index: 8, kind: input, shape index: {}]   ;;  %s2689_s9 = inlined_call_operand.vmem [shape: f32[8,1], index: 9, kind: output, shape index: {}]  }
   0x1   :  { %v14_v0 = vstv %s2688_s8 }
   0x2   :  { %15 = vst [vmem:[#allocation2] sm:$0x1] %v14_v0 }
   0x3   :  { %16 = vsyncpa [#allocation4], 0 }
   0x4   :  { %17 = vsyncpa [#allocation6], 0  ;;  %s34_s13 = sshll.u32 %s2681_s1, 4  ;;  %s35_s13 = int_to_ptr.hbm [resolvable:$true] %s34_s13 }
   0x5   :  { %18 = vsyncpa [#allocation9], 0  ;;  %s2562_s14 = smov [#allocation5]   ;;  %s58_s18 = sshll.u32 %s2683_s3, 4  ;;  %s59_s18 = int_to_ptr.hbm [resolvable:$true] %s58_s18 }
   0x6   :  { %s36_s15 = sshll.u32 %s2562_s14, 4  ;;  %s2563_s19 = smov 256   ;;  %s37_s15 = int_to_ptr.vmem [resolvable:$true] %s36_s15 }
   0x7   :  { %s2564_s20 = smov 16   ;;  %s2565_s8 = smov [#allocation8]  }
   0x8   :  { %42 = dma.hbm_to_vmem [thread:$0]  %s35_s13, 12288, %s37_s15, [#allocation6], %s2563_s19, %s2563_s19, %s2564_s20  }
   0x9   :  { %s60_s21 = sshll.u32 %s2565_s8, 4  ;;  %s2566_s22 = smov 128   ;;  %s61_s21 = int_to_ptr.vmem [resolvable:$true] %s60_s21 }
   0xa   :  { %s2567_s23 = smov 8   ;;  %s24_s25 = sshll.u32 %s2680_s0, 4  ;;  %s25_s25 = int_to_ptr.hbm [resolvable:$true] %s24_s25 }
   0xb   :  { %66 = dma.hbm_to_vmem [thread:$0]  %s59_s18, 8192, %s61_s21, [#allocation9], %s2566_s22, %s2566_s22, %s2567_s23  }
   0xc   :  { %s2568_s26 = smov [#allocation3]   ;;  %s48_s29 = sshll.u32 %s2682_s2, 4  ;;  %s49_s29 = int_to_ptr.hbm [resolvable:$true] %s48_s29 }
   0xd   :  { %s26_s27 = sshll.u32 %s2568_s26, 4  ;;  %s2569_s30 = smov [#allocation7]   ;;  %s27_s27 = int_to_ptr.vmem [resolvable:$true] %s26_s27 }
   0xe   :  { %29 = dma.hbm_to_vmem [thread:$0]  %s25_s25, 384, %s27_s27, [#allocation4]  }
   0xf   :  { %s50_s10 = sshll.u32 %s2569_s30, 4  ;;  %s73_s13 = sshll.u32 %s2685_s5, 4  ;;  %s51_s10 = int_to_ptr.vmem [resolvable:$true] %s50_s10  ;;  %s74_s13 = int_to_ptr.hbm [resolvable:$true] %s73_s13 }
  0x10   :  { %53 = dma.hbm_to_vmem [thread:$0]  %s49_s29, 64, %s51_s10, [#allocation6]  }
  0x11   :  { %s2570_s0 = smov [#allocation10]   ;;  %s2571_s15 = smov 64  }
  0x12   :  { %s75_s14 = sshll.u32 %s2570_s0, 4  ;;  %s2572_s16 = smov 4   ;;  %s76_s14 = int_to_ptr.vmem [resolvable:$true] %s75_s14 }
  0x13   :  { %81 = dma.hbm_to_vmem [thread:$0]  %s74_s13, 2048, %s76_s14, [#allocation9], %s2571_s15, %s2571_s15, %s2572_s16  }
  0x14   :  { %2556 = dma.done.wait [#allocation4], 384  }
  0x15   :  { %2557 = vsyncadd [#allocation4], 4294966912 }
  0x16   :  { %2558 = dma.done.wait [#allocation6], 12352  }
  0x17   :  { %2559 = vsyncadd [#allocation6], 4294954944 }
  0x18   :  { %2560 = dma.done.wait [#allocation9], 10240  }
  0x19   :  { %2561 = vsyncadd [#allocation9], 4294957056  ;;  %v1656_v1 = vld [vmem:[#allocation5 + $0xe0] sm:$0xf]  ;;  %v2276_v2 = vld [vmem:[#allocation5 + $0xec] sm:$0xf0] }
  0x1a   :  { %v1784_v3 = vld [vmem:[#allocation5 + $0x1e0] sm:$0xf]  ;;  %v1657_v4 = vor.u32 %v2276_v2, %v1656_v1  ;;  %v2308_v5 = vld [vmem:[#allocation5 + $0x1ec] sm:$0xf0]  ;;  %v2274_v10 = vld [vmem:[#allocation5 + $0xe4] sm:$0xf] }
  0x1b   :  { %v1912_v6 = vld [vmem:[#allocation5 + $0x2e0] sm:$0xf]  ;;  %v2340_v7 = vld [vmem:[#allocation5 + $0x2ec] sm:$0xf0]  ;;  %v1785_v8 = vor.u32 %v2308_v5, %v1784_v3  ;;  %v1658_v11 = vld [vmem:[#allocation5 + $0xf0] sm:$0xf0] }
  0x1c   :  { %v1913_v9 = vor.u32 %v2340_v7, %v1912_v6  ;;  %v1640_v12 = vld [vmem:[#allocation5 + $0xc0] sm:$0xf]  ;;  %700 = vmatpush.bf16.msra.mxu0 %v1657_v4  ;;  %v1661_v13 = vor.u32 %v2274_v10, %v1658_v11  ;;  %v2272_v14 = vld [vmem:[#allocation5 + $0xcc] sm:$0xf0]  ;;  %v2270_v21 = vld [vmem:[#allocation5 + $0xc4] sm:$0xf] }
  0x1d   :  { %v1768_v15 = vld [vmem:[#allocation5 + $0x1c0] sm:$0xf]  ;;  %v2304_v16 = vld [vmem:[#allocation5 + $0x1cc] sm:$0xf0]  ;;  %713 = vmatpush.bf16.msra.mxu1 %v1785_v8  ;;  %v1641_v17 = vor.u32 %v2272_v14, %v1640_v12  ;;  %v1642_v23 = vld [vmem:[#allocation5 + $0xd0] sm:$0xf0] }
  0x1e   :  { %726 = vmatpush.bf16.msra.mxu2 %v1913_v9  ;;  %v1769_v18 = vor.u32 %v2304_v16, %v1768_v15  ;;  %v1896_v19 = vld [vmem:[#allocation5 + $0x2c0] sm:$0xf]  ;;  %v2336_v20 = vld [vmem:[#allocation5 + $0x2cc] sm:$0xf0]  ;;  %739 = vmatpush.bf16.msra.mxu3 %v1661_v13  ;;  %v1645_v26 = vor.u32 %v2270_v21, %v1642_v23  ;;  %v2266_v32 = vld [vmem:[#allocation5 + $0xa4] sm:$0xf] }
  0x1f   :  { %v1897_v22 = vor.u32 %v2336_v20, %v1896_v19  ;;  %v1624_v24 = vld [vmem:[#allocation5 + $0xa0] sm:$0xf]  ;;  %v2268_v25 = vld [vmem:[#allocation5 + $0xac] sm:$0xf0]  ;;  %v1626_v33 = vld [vmem:[#allocation5 + $0xb0] sm:$0xf0] }
  0x20   :  { %v1752_v27 = vld [vmem:[#allocation5 + $0x1a0] sm:$0xf]  ;;  %v2300_v28 = vld [vmem:[#allocation5 + $0x1ac] sm:$0xf0]  ;;  %701 = vmatpush.bf16.msra.mxu0 %v1641_v17  ;;  %v1625_v30 = vor.u32 %v2268_v25, %v1624_v24  ;;  %v1629_v39 = vor.u32 %v2266_v32, %v1626_v33  ;;  %v2262_v43 = vld [vmem:[#allocation5 + $0x84] sm:$0xf] }
  0x21   :  { %v1880_v29 = vld [vmem:[#allocation5 + $0x2a0] sm:$0xf]  ;;  %v2332_v31 = vld [vmem:[#allocation5 + $0x2ac] sm:$0xf0]  ;;  %714 = vmatpush.bf16.msra.mxu1 %v1769_v18  ;;  %v1753_v34 = vor.u32 %v2300_v28, %v1752_v27  ;;  %v1610_v44 = vld [vmem:[#allocation5 + $0x90] sm:$0xf0] }
  0x22   :  { %727 = vmatpush.bf16.msra.mxu2 %v1897_v22  ;;  %v1881_v35 = vor.u32 %v2332_v31, %v1880_v29  ;;  %v1608_v36 = vld [vmem:[#allocation5 + $0x80] sm:$0xf]  ;;  %v2264_v37 = vld [vmem:[#allocation5 + $0x8c] sm:$0xf0]  ;;  %740 = vmatpush.bf16.msra.mxu3 %v1645_v26  ;;  %v1613_v51 = vor.u32 %v2262_v43, %v1610_v44  ;;  %v2258_v55 = vld [vmem:[#allocation5 + $0x64] sm:$0xf] }
  0x23   :  { %v1736_v38 = vld [vmem:[#allocation5 + $0x180] sm:$0xf]  ;;  %v2296_v40 = vld [vmem:[#allocation5 + $0x18c] sm:$0xf0]  ;;  %v1609_v45 = vor.u32 %v2264_v37, %v1608_v36  ;;  %v1594_v56 = vld [vmem:[#allocation5 + $0x70] sm:$0xf0] }
  0x24   :  { %v1864_v41 = vld [vmem:[#allocation5 + $0x280] sm:$0xf]  ;;  %v2328_v42 = vld [vmem:[#allocation5 + $0x28c] sm:$0xf0]  ;;  %702 = vmatpush.bf16.msra.mxu0 %v1625_v30  ;;  %v1737_v46 = vor.u32 %v2296_v40, %v1736_v38  ;;  %v1597_v63 = vor.u32 %v2258_v55, %v1594_v56  ;;  %v2254_v3 = vld [vmem:[#allocation5 + $0x44] sm:$0xf] }
  0x25   :  { %715 = vmatpush.bf16.msra.mxu1 %v1753_v34  ;;  %v1865_v47 = vor.u32 %v2328_v42, %v1864_v41  ;;  %v1592_v48 = vld [vmem:[#allocation5 + $0x60] sm:$0xf]  ;;  %v2260_v49 = vld [vmem:[#allocation5 + $0x6c] sm:$0xf0]  ;;  %v1578_v4 = vld [vmem:[#allocation5 + $0x50] sm:$0xf0] }
  0x26   :  { %728 = vmatpush.bf16.msra.mxu2 %v1881_v35  ;;  %v1720_v50 = vld [vmem:[#allocation5 + $0x160] sm:$0xf]  ;;  %741 = vmatpush.bf16.msra.mxu3 %v1629_v39  ;;  %v2292_v52 = vld [vmem:[#allocation5 + $0x16c] sm:$0xf0]  ;;  %v1593_v57 = vor.u32 %v2260_v49, %v1592_v48  ;;  %v1581_v11 = vor.u32 %v2254_v3, %v1578_v4  ;;  %v2250_v15 = vld [vmem:[#allocation5 + $0x24] sm:$0xf] }
  0x27   :  { %v1848_v53 = vld [vmem:[#allocation5 + $0x260] sm:$0xf]  ;;  %v2324_v54 = vld [vmem:[#allocation5 + $0x26c] sm:$0xf0]  ;;  %v1721_v58 = vor.u32 %v2292_v52, %v1720_v50  ;;  %v1562_v16 = vld [vmem:[#allocation5 + $0x30] sm:$0xf0] }
  0x28   :  { %703 = vmatpush.bf16.msra.mxu0 %v1609_v45  ;;  %v1849_v59 = vor.u32 %v2324_v54, %v1848_v53  ;;  %v1576_v60 = vld [vmem:[#allocation5 + $0x40] sm:$0xf]  ;;  %v2256_v61 = vld [vmem:[#allocation5 + $0x4c] sm:$0xf0]  ;;  %v1565_v25 = vor.u32 %v2250_v15, %v1562_v16  ;;  %v2246_v27 = vld [vmem:[#allocation5 + $0x4] sm:$0xf] }
  0x29   :  { %716 = vmatpush.bf16.msra.mxu1 %v1737_v46  ;;  %v1704_v62 = vld [vmem:[#allocation5 + $0x140] sm:$0xf]  ;;  %v2288_v0 = vld [vmem:[#allocation5 + $0x14c] sm:$0xf0]  ;;  %v1577_v5 = vor.u32 %v2256_v61, %v1576_v60  ;;  %v1546_v28 = vld [vmem:[#allocation5 + $0x10] sm:$0xf0] }
  0x2a   :  { %729 = vmatpush.bf16.msra.mxu2 %v1865_v47  ;;  %742 = vmatpush.bf16.msra.mxu3 %v1613_v51  ;;  %v1832_v1 = vld [vmem:[#allocation5 + $0x240] sm:$0xf]  ;;  %v2320_v2 = vld [vmem:[#allocation5 + $0x24c] sm:$0xf0]  ;;  %v1705_v6 = vor.u32 %v2288_v0, %v1704_v62  ;;  %v2306_v29 = vld [vmem:[#allocation5 + $0x1e4] sm:$0xf]  ;;  %v1549_v41 = vor.u32 %v2246_v27, %v1546_v28 }
  0x2b   :  { %v1833_v7 = vor.u32 %v2320_v2, %v1832_v1  ;;  %v1560_v8 = vld [vmem:[#allocation5 + $0x20] sm:$0xf]  ;;  %v2252_v9 = vld [vmem:[#allocation5 + $0x2c] sm:$0xf0]  ;;  %v1786_v30 = vld [vmem:[#allocation5 + $0x1f0] sm:$0xf0] }
  0x2c   :  { %704 = vmatpush.bf16.msra.mxu0 %v1593_v57  ;;  %v1688_v10 = vld [vmem:[#allocation5 + $0x120] sm:$0xf]  ;;  %v2284_v12 = vld [vmem:[#allocation5 + $0x12c] sm:$0xf0]  ;;  %v1561_v17 = vor.u32 %v2252_v9, %v1560_v8  ;;  %v2338_v31 = vld [vmem:[#allocation5 + $0x2e4] sm:$0xf]  ;;  %v1789_v42 = vor.u32 %v2306_v29, %v1786_v30 }
  0x2d   :  { %717 = vmatpush.bf16.msra.mxu1 %v1721_v58  ;;  %v1816_v13 = vld [vmem:[#allocation5 + $0x220] sm:$0xf]  ;;  %v2316_v14 = vld [vmem:[#allocation5 + $0x22c] sm:$0xf0]  ;;  %v1689_v20 = vor.u32 %v2284_v12, %v1688_v10  ;;  %v1914_v33 = vld [vmem:[#allocation5 + $0x2f0] sm:$0xf0] }
  0x2e   :  { %730 = vmatpush.bf16.msra.mxu2 %v1849_v59  ;;  %743 = vmatpush.bf16.msra.mxu3 %v1597_v63  ;;  %v1544_v18 = vld [vmem:[#allocation5] sm:$0xf]  ;;  %v2248_v19 = vld [vmem:[#allocation5 + $0xc] sm:$0xf0]  ;;  %v1817_v21 = vor.u32 %v2316_v14, %v1816_v13  ;;  %v1664_v34 = vld [vmem:[#allocation5 + $0xe8] sm:$0xf]  ;;  %v1917_v45 = vor.u32 %v2338_v31, %v1914_v33 }
  0x2f   :  { %v1672_v22 = vld [vmem:[#allocation5 + $0x100] sm:$0xf]  ;;  %v2280_v23 = vld [vmem:[#allocation5 + $0x10c] sm:$0xf0]  ;;  %v1545_v32 = vor.u32 %v2248_v19, %v1544_v18  ;;  %v2277_v35 = vld [vmem:[#allocation5 + $0xf4] sm:$0xf0] }
  0x30   :  { %705 = vmatpush.bf16.msra.mxu0 %v1577_v5  ;;  %v1800_v24 = vld [vmem:[#allocation5 + $0x200] sm:$0xf]  ;;  %v2312_v26 = vld [vmem:[#allocation5 + $0x20c] sm:$0xf0]  ;;  %v1673_v36 = vor.u32 %v2280_v23, %v1672_v22  ;;  %v1792_v38 = vld [vmem:[#allocation5 + $0x1e8] sm:$0xf]  ;;  %v1665_v46 = vor.u32 %v2277_v35, %v1664_v34 }
  0x31   :  { %718 = vmatpush.bf16.msra.mxu1 %v1705_v6  ;;  %v1801_v37 = vor.u32 %v2312_v26, %v1800_v24  ;;  %v2309_v39 = vld [vmem:[#allocation5 + $0x1f4] sm:$0xf0]  ;;  %v108_v43 = vld [vmem:[#allocation3] sm:$0xff]  ;;  %v109_v44 = vld [vmem:[#allocation3 + $0x8] sm:$0xff]  ;;  %vm1533_vm0 = vcmask 7168  }
  0x32   :  { %731 = vmatpush.bf16.msra.mxu2 %v1833_v7  ;;  %744 = vmatpush.bf16.msra.mxu3 %v1581_v11  ;;  %v110_v40 = vld [vmem:[#allocation3 + $0x10] sm:$0xff]  ;;  %v2302_v47 = vld [vmem:[#allocation5 + $0x1c4] sm:$0xf]  ;;  %v1770_v48 = vld [vmem:[#allocation5 + $0x1d0] sm:$0xf0]  ;;  %v1793_v50 = vor.u32 %v2309_v39, %v1792_v38  ;;  %v2643_v57 = vpack.c.bf16 %v108_v43, %v108_v43  ;;  %v2645_v58 = vpack.c.bf16 %v109_v44, %v109_v44 }
  0x33   :  { %v2334_v49 = vld [vmem:[#allocation5 + $0x2c4] sm:$0xf]  ;;  %v2641_v51 = vpack.c.bf16 %v110_v40, %v110_v40  ;;  %v1898_v52 = vld [vmem:[#allocation5 + $0x2d0] sm:$0xf0]  ;;  %v1648_v53 = vld [vmem:[#allocation5 + $0xc8] sm:$0xf]  ;;  %v1773_v59 = vor.u32 %v2302_v47, %v1770_v48 }
  0x34   :  { %706 = vmatpush.bf16.msra.mxu0 %v1561_v17  ;;  %v2273_v54 = vld [vmem:[#allocation5 + $0xd4] sm:$0xf0]  ;;  %v1776_v55 = vld [vmem:[#allocation5 + $0x1c8] sm:$0xf]  ;;  %v1901_v60 = vor.u32 %v2334_v49, %v1898_v52  ;;  %v2298_v62 = vld [vmem:[#allocation5 + $0x1a4] sm:$0xf] }
  0x35   :  { %719 = vmatpush.bf16.msra.mxu1 %v1689_v20  ;;  %v2305_v56 = vld [vmem:[#allocation5 + $0x1d4] sm:$0xf0]  ;;  %v1649_v61 = vor.u32 %v2273_v54, %v1648_v53  ;;  %v1754_v63 = vld [vmem:[#allocation5 + $0x1b0] sm:$0xf0]  ;;  %v2330_v0 = vld [vmem:[#allocation5 + $0x2a4] sm:$0xf] }
  0x36   :  { %732 = vmatpush.bf16.msra.mxu2 %v1817_v21  ;;  %745 = vmatpush.bf16.msra.mxu3 %v1565_v25  ;;  %v1777_v1 = vor.u32 %v2305_v56, %v1776_v55  ;;  %v1882_v2 = vld [vmem:[#allocation5 + $0x2b0] sm:$0xf0]  ;;  %v1632_v3 = vld [vmem:[#allocation5 + $0xa8] sm:$0xf]  ;;  %v2269_v4 = vld [vmem:[#allocation5 + $0xb4] sm:$0xf0]  ;;  %v1757_v7 = vor.u32 %v2298_v62, %v1754_v63 }
  0x37   :  { %v1760_v5 = vld [vmem:[#allocation5 + $0x1a8] sm:$0xf]  ;;  %v2301_v6 = vld [vmem:[#allocation5 + $0x1b4] sm:$0xf0]  ;;  %v1885_v8 = vor.u32 %v2330_v0, %v1882_v2  ;;  %v1633_v9 = vor.u32 %v2269_v4, %v1632_v3  ;;  %v2294_v10 = vld [vmem:[#allocation5 + $0x184] sm:$0xf] }
  0x38   :  { %707 = vmatpush.bf16.msra.mxu0 %v1545_v32  ;;  %v1738_v11 = vld [vmem:[#allocation5 + $0x190] sm:$0xf0]  ;;  %v2326_v12 = vld [vmem:[#allocation5 + $0x284] sm:$0xf]  ;;  %v1761_v13 = vor.u32 %v2301_v6, %v1760_v5  ;;  %v1616_v15 = vld [vmem:[#allocation5 + $0x88] sm:$0xf] }
  0x39   :  { %720 = vmatpush.bf16.msra.mxu1 %v1673_v36  ;;  %v1866_v14 = vld [vmem:[#allocation5 + $0x290] sm:$0xf0]  ;;  %v2265_v16 = vld [vmem:[#allocation5 + $0x94] sm:$0xf0]  ;;  %v1744_v17 = vld [vmem:[#allocation5 + $0x188] sm:$0xf]  ;;  %v1741_v19 = vor.u32 %v2294_v10, %v1738_v11 }
  0x3a   :  { %733 = vmatpush.bf16.msra.mxu2 %v1801_v37  ;;  %746 = vmatpush.bf16.msra.mxu3 %v1549_v41  ;;  %v2297_v18 = vld [vmem:[#allocation5 + $0x194] sm:$0xf0]  ;;  %v1869_v20 = vor.u32 %v2326_v12, %v1866_v14  ;;  %v1617_v21 = vor.u32 %v2265_v16, %v1616_v15  ;;  %v2290_v22 = vld [vmem:[#allocation5 + $0x164] sm:$0xf]  ;;  %v1722_v23 = vld [vmem:[#allocation5 + $0x170] sm:$0xf0] }
  0x3b   :  { %708 = vmatmul.bf16.vlgmr.msra.gmra.mxu0 %v2643_v57  ;;  %v2322_v24 = vld [vmem:[#allocation5 + $0x264] sm:$0xf]  ;;  %v1745_v25 = vor.u32 %v2297_v18, %v1744_v17  ;;  %v1850_v26 = vld [vmem:[#allocation5 + $0x270] sm:$0xf0]  ;;  %v1600_v27 = vld [vmem:[#allocation5 + $0x68] sm:$0xf]  ;;  %v1725_v31 = vor.u32 %v2290_v22, %v1722_v23 }
  0x3c   :  { %752 = vmatpush.bf16.msrb.mxu0 %v1789_v42  ;;  %721 = vmatmul.bf16.vlgmr.msra.gmra.mxu1 %v2645_v58  ;;  %v2261_v28 = vld [vmem:[#allocation5 + $0x74] sm:$0xf0]  ;;  %v1728_v29 = vld [vmem:[#allocation5 + $0x168] sm:$0xf]  ;;  %v1853_v32 = vor.u32 %v2322_v24, %v1850_v26  ;;  %v2286_v34 = vld [vmem:[#allocation5 + $0x144] sm:$0xf] }
  0x3d   :  { %765 = vmatpush.bf16.msrb.mxu1 %v1917_v45  ;;  %734 = vmatmul.bf16.vlgmr.msra.gmra.mxu2 %v2641_v51  ;;  %v2293_v30 = vld [vmem:[#allocation5 + $0x174] sm:$0xf0]  ;;  %v1601_v33 = vor.u32 %v2261_v28, %v1600_v27  ;;  %v1706_v35 = vld [vmem:[#allocation5 + $0x150] sm:$0xf0]  ;;  %v2318_v36 = vld [vmem:[#allocation5 + $0x244] sm:$0xf] }
  0x3e   :  { %778 = vmatpush.bf16.msrb.mxu2 %v1665_v46  ;;  %791 = vmatpush.bf16.msrb.mxu3 %v1793_v50  ;;  %v1729_v37 = vor.u32 %v2293_v30, %v1728_v29  ;;  %v1834_v38 = vld [vmem:[#allocation5 + $0x250] sm:$0xf0]  ;;  %v1584_v39 = vld [vmem:[#allocation5 + $0x48] sm:$0xf]  ;;  %v2257_v40 = vld [vmem:[#allocation5 + $0x54] sm:$0xf0]  ;;  %v1709_v43 = vor.u32 %v2286_v34, %v1706_v35 }
  0x3f   :  { %747 = vmatmul.bf16.vlgmr.msra.gmra.mxu3 %v2643_v57  ;;  %v1712_v41 = vld [vmem:[#allocation5 + $0x148] sm:$0xf]  ;;  %v2289_v42 = vld [vmem:[#allocation5 + $0x154] sm:$0xf0]  ;;  %v1837_v44 = vor.u32 %v2318_v36, %v1834_v38  ;;  %v1585_v45 = vor.u32 %v2257_v40, %v1584_v39  ;;  %v2282_v46 = vld [vmem:[#allocation5 + $0x124] sm:$0xf] }
  0x40   :  { %753 = vmatpush.bf16.msrb.mxu0 %v1773_v59  ;;  %v1690_v47 = vld [vmem:[#allocation5 + $0x130] sm:$0xf0]  ;;  %v2314_v48 = vld [vmem:[#allocation5 + $0x224] sm:$0xf]  ;;  %v1713_v49 = vor.u32 %v2289_v42, %v1712_v41  ;;  %v1568_v52 = vld [vmem:[#allocation5 + $0x28] sm:$0xf] }
  0x41   :  { %766 = vmatpush.bf16.msrb.mxu1 %v1901_v60  ;;  %v1818_v50 = vld [vmem:[#allocation5 + $0x230] sm:$0xf0]  ;;  %v2253_v53 = vld [vmem:[#allocation5 + $0x34] sm:$0xf0]  ;;  %v1696_v54 = vld [vmem:[#allocation5 + $0x128] sm:$0xf]  ;;  %v1693_v56 = vor.u32 %v2282_v46, %v1690_v47 }
  0x42   :  { %779 = vmatpush.bf16.msrb.mxu2 %v1649_v61  ;;  %792 = vmatpush.bf16.msrb.mxu3 %v1777_v1  ;;  %v2285_v55 = vld [vmem:[#allocation5 + $0x134] sm:$0xf0]  ;;  %v2278_v59 = vld [vmem:[#allocation5 + $0x104] sm:$0xf]  ;;  %v1674_v60 = vld [vmem:[#allocation5 + $0x110] sm:$0xf0]  ;;  %v1821_v61 = vor.u32 %v2314_v48, %v1818_v50  ;;  %v1569_v62 = vor.u32 %v2253_v53, %v1568_v52 }
  0x43   :  { %v2310_v63 = vld [vmem:[#allocation5 + $0x204] sm:$0xf]  ;;  %v1802_v0 = vld [vmem:[#allocation5 + $0x210] sm:$0xf0]  ;;  %v1552_v1 = vld [vmem:[#allocation5 + $0x8] sm:$0xf]  ;;  %v1697_v2 = vor.u32 %v2285_v55, %v1696_v54 }
  0x44   :  { %754 = vmatpush.bf16.msrb.mxu0 %v1757_v7  ;;  %v2249_v3 = vld [vmem:[#allocation5 + $0x14] sm:$0xf0]  ;;  %v1680_v4 = vld [vmem:[#allocation5 + $0x108] sm:$0xf]  ;;  %v1666_v10 = vld [vmem:[#allocation5 + $0xf8] sm:$0xf0] }
  0x45   :  { %767 = vmatpush.bf16.msrb.mxu1 %v1885_v8  ;;  %v2281_v5 = vld [vmem:[#allocation5 + $0x114] sm:$0xf0]  ;;  %v1920_v6 = vld [vmem:[#allocation5 + $0x2e8] sm:$0xf]  ;;  %v2275_v8 = vld [vmem:[#allocation5 + $0xec] sm:$0xf]  ;;  %v1553_v14 = vor.u32 %v2249_v3, %v1552_v1 }
  0x46   :  { %780 = vmatpush.bf16.msrb.mxu2 %v1633_v9  ;;  %793 = vmatpush.bf16.msrb.mxu3 %v1761_v13  ;;  %v2341_v7 = vld [vmem:[#allocation5 + $0x2f4] sm:$0xf0]  ;;  %v1677_v9 = vor.u32 %v2278_v59, %v1674_v60  ;;  %v2307_v11 = vld [vmem:[#allocation5 + $0x1ec] sm:$0xf]  ;;  %v1794_v12 = vld [vmem:[#allocation5 + $0x1f8] sm:$0xf0]  ;;  %v1805_v13 = vor.u32 %v2310_v63, %v1802_v0  ;;  %v1681_v17 = vor.u32 %v2281_v5, %v1680_v4 }
  0x47   :  { %v2339_v15 = vld [vmem:[#allocation5 + $0x2ec] sm:$0xf]  ;;  %v1922_v16 = vld [vmem:[#allocation5 + $0x2f8] sm:$0xf0]  ;;  %v1921_v18 = vor.u32 %v2341_v7, %v1920_v6  ;;  %v2337_v22 = vld [vmem:[#allocation5 + $0x2d4] sm:$0xf0] }
  0x48   :  { %755 = vmatpush.bf16.msrb.mxu0 %v1741_v19  ;;  %v1669_v19 = vor.u32 %v2275_v8, %v1666_v10  ;;  %v2271_v23 = vld [vmem:[#allocation5 + $0xcc] sm:$0xf]  ;;  %v1925_v24 = vor.u32 %v2339_v15, %v1922_v16  ;;  %v1778_v27 = vld [vmem:[#allocation5 + $0x1d8] sm:$0xf0]  ;;  %v2333_v34 = vld [vmem:[#allocation5 + $0x2b4] sm:$0xf0] }
  0x49   :  { %768 = vmatpush.bf16.msrb.mxu1 %v1869_v20  ;;  %v1797_v20 = vor.u32 %v2307_v11, %v1794_v12  ;;  %v2303_v26 = vld [vmem:[#allocation5 + $0x1cc] sm:$0xf]  ;;  %v1906_v29 = vld [vmem:[#allocation5 + $0x2d8] sm:$0xf0]  ;;  %v2329_v46 = vld [vmem:[#allocation5 + $0x294] sm:$0xf0] }
  0x4a   :  { %781 = vmatpush.bf16.msrb.mxu2 %v1617_v21  ;;  %794 = vmatpush.bf16.msrb.mxu3 %v1745_v25  ;;  %v1904_v21 = vld [vmem:[#allocation5 + $0x2c8] sm:$0xf]  ;;  %v1650_v25 = vld [vmem:[#allocation5 + $0xd8] sm:$0xf0]  ;;  %v2335_v28 = vld [vmem:[#allocation5 + $0x2cc] sm:$0xf] }
  0x4b   :  { %v1905_v30 = vor.u32 %v2337_v22, %v1904_v21  ;;  %v2267_v35 = vld [vmem:[#allocation5 + $0xac] sm:$0xf]  ;;  %v1909_v36 = vor.u32 %v2335_v28, %v1906_v29  ;;  %v1762_v39 = vld [vmem:[#allocation5 + $0x1b8] sm:$0xf0]  ;;  %v1856_v60 = vld [vmem:[#allocation5 + $0x268] sm:$0xf] }
  0x4c   :  { %756 = vmatpush.bf16.msrb.mxu0 %v1725_v31  ;;  %v1653_v31 = vor.u32 %v2271_v23, %v1650_v25  ;;  %v2299_v38 = vld [vmem:[#allocation5 + $0x1ac] sm:$0xf]  ;;  %v1890_v41 = vld [vmem:[#allocation5 + $0x2b8] sm:$0xf0]  ;;  %v1840_v8 = vld [vmem:[#allocation5 + $0x248] sm:$0xf] }
  0x4d   :  { %769 = vmatpush.bf16.msrb.mxu1 %v1853_v32  ;;  %v1781_v32 = vor.u32 %v2303_v26, %v1778_v27  ;;  %v2331_v40 = vld [vmem:[#allocation5 + $0x2ac] sm:$0xf]  ;;  %v1746_v52 = vld [vmem:[#allocation5 + $0x198] sm:$0xf0]  ;;  %v2317_v21 = vld [vmem:[#allocation5 + $0x234] sm:$0xf0] }
  0x4e   :  { %782 = vmatpush.bf16.msrb.mxu2 %v1601_v33  ;;  %795 = vmatpush.bf16.msrb.mxu3 %v1729_v37  ;;  %v1888_v33 = vld [vmem:[#allocation5 + $0x2a8] sm:$0xf]  ;;  %v1634_v37 = vld [vmem:[#allocation5 + $0xb8] sm:$0xf0]  ;;  %v2263_v47 = vld [vmem:[#allocation5 + $0x8c] sm:$0xf]  ;;  %v1893_v48 = vor.u32 %v2331_v40, %v1890_v41 }
  0x4f   :  { %v1889_v42 = vor.u32 %v2333_v34, %v1888_v33  ;;  %v2295_v50 = vld [vmem:[#allocation5 + $0x18c] sm:$0xf]  ;;  %v1874_v54 = vld [vmem:[#allocation5 + $0x298] sm:$0xf0]  ;;  %v2313_v33 = vld [vmem:[#allocation5 + $0x214] sm:$0xf0] }
  0x50   :  { %757 = vmatpush.bf16.msrb.mxu0 %v1709_v43  ;;  %v1637_v43 = vor.u32 %v2267_v35, %v1634_v37  ;;  %v2327_v53 = vld [vmem:[#allocation5 + $0x28c] sm:$0xf]  ;;  %v1749_v59 = vor.u32 %v2295_v50, %v1746_v52  ;;  %v1602_v0 = vld [vmem:[#allocation5 + $0x78] sm:$0xf0]  ;;  %v1984_v41 = vld [vmem:[#allocation8 + $0x70] sm:$0xf] }
  0x51   :  { %770 = vmatpush.bf16.msrb.mxu1 %v1837_v44  ;;  %v1765_v44 = vor.u32 %v2299_v38, %v1762_v39  ;;  %v1877_v63 = vor.u32 %v2327_v53, %v1874_v54  ;;  %v2291_v1 = vld [vmem:[#allocation5 + $0x16c] sm:$0xf]  ;;  %v1858_v4 = vld [vmem:[#allocation5 + $0x278] sm:$0xf0]  ;;  %v1976_v50 = vld [vmem:[#allocation8 + $0x60] sm:$0xf] }
  0x52   :  { %783 = vmatpush.bf16.msrb.mxu2 %v1585_v45  ;;  %796 = vmatpush.bf16.msrb.mxu3 %v1713_v49  ;;  %v1872_v45 = vld [vmem:[#allocation5 + $0x288] sm:$0xf]  ;;  %v1618_v49 = vld [vmem:[#allocation5 + $0x98] sm:$0xf0]  ;;  %v2323_v3 = vld [vmem:[#allocation5 + $0x26c] sm:$0xf] }
  0x53   :  { %v1873_v55 = vor.u32 %v2329_v46, %v1872_v45  ;;  %v2255_v10 = vld [vmem:[#allocation5 + $0x4c] sm:$0xf]  ;;  %v1861_v11 = vor.u32 %v2323_v3, %v1858_v4  ;;  %v1586_v12 = vld [vmem:[#allocation5 + $0x58] sm:$0xf0]  ;;  %v2040_v54 = vld [vmem:[#allocation8 + $0xe0] sm:$0xf] }
  0x54   :  { %758 = vmatpush.bf16.msrb.mxu0 %v1693_v56  ;;  %v1621_v56 = vor.u32 %v2263_v47, %v1618_v49  ;;  %v2319_v15 = vld [vmem:[#allocation5 + $0x24c] sm:$0xf]  ;;  %v1842_v16 = vld [vmem:[#allocation5 + $0x258] sm:$0xf0] }
  0x55   :  { %771 = vmatpush.bf16.msrb.mxu1 %v1821_v61  ;;  %v2325_v61 = vld [vmem:[#allocation5 + $0x274] sm:$0xf0]  ;;  %v2251_v22 = vld [vmem:[#allocation5 + $0x2c] sm:$0xf]  ;;  %v1845_v23 = vor.u32 %v2319_v15, %v1842_v16  ;;  %v1698_v26 = vld [vmem:[#allocation5 + $0x138] sm:$0xf0] }
  0x56   :  { %784 = vmatpush.bf16.msrb.mxu2 %v1569_v62  ;;  %797 = vmatpush.bf16.msrb.mxu3 %v1697_v2  ;;  %v2259_v62 = vld [vmem:[#allocation5 + $0x6c] sm:$0xf]  ;;  %v1730_v2 = vld [vmem:[#allocation5 + $0x178] sm:$0xf0]  ;;  %v1857_v5 = vor.u32 %v2325_v61, %v1856_v60 }
  0x57   :  { %v1605_v6 = vor.u32 %v2259_v62, %v1602_v0  ;;  %v1733_v7 = vor.u32 %v2291_v1, %v1730_v2  ;;  %v2283_v25 = vld [vmem:[#allocation5 + $0x12c] sm:$0xf]  ;;  %v1826_v28 = vld [vmem:[#allocation5 + $0x238] sm:$0xf0]  ;;  %v2032_v62 = vld [vmem:[#allocation8 + $0xd0] sm:$0xf] }
  0x58   :  { %759 = vmatpush.bf16.msrb.mxu0 %v1677_v9  ;;  %v2321_v9 = vld [vmem:[#allocation5 + $0x254] sm:$0xf0]  ;;  %v2315_v27 = vld [vmem:[#allocation5 + $0x22c] sm:$0xf]  ;;  %v1554_v35 = vld [vmem:[#allocation5 + $0x18] sm:$0xf0] }
  0x59   :  { %772 = vmatpush.bf16.msrb.mxu1 %v1805_v13  ;;  %v2287_v13 = vld [vmem:[#allocation5 + $0x14c] sm:$0xf]  ;;  %v1682_v38 = vld [vmem:[#allocation5 + $0x118] sm:$0xf0]  ;;  %v1960_v1 = vld [vmem:[#allocation8 + $0x40] sm:$0xf] }
  0x5a   :  { %785 = vmatpush.bf16.msrb.mxu2 %v1553_v14  ;;  %798 = vmatpush.bf16.msrb.mxu3 %v1681_v17  ;;  %v1714_v14 = vld [vmem:[#allocation5 + $0x158] sm:$0xf0]  ;;  %v1841_v17 = vor.u32 %v2321_v9, %v1840_v8  ;;  %v2247_v34 = vld [vmem:[#allocation5 + $0xc] sm:$0xf]  ;;  %v1936_v9 = vld [vmem:[#allocation8 + $0x10] sm:$0xf] }
  0x5b   :  { %760 = vmatmul.bf16.vlgmr.msrb.gmra.mxu0 %v2645_v58  ;;  %v2279_v37 = vld [vmem:[#allocation5 + $0x10c] sm:$0xf]  ;;  %v1810_v40 = vld [vmem:[#allocation5 + $0x218] sm:$0xf0]  ;;  %v1557_v46 = vor.u32 %v2247_v34, %v1554_v35  ;;  %v2348_v35 = vld [vmem:[#allocation8 + $0x34] sm:$0xf] }
  0x5c   :  { %804 = vmatpush.bf16.msra.mxu0 %v1921_v18  ;;  %773 = vmatmul.bf16.vlgmr.msrb.gmra.mxu1 %v2641_v51  ;;  %v1589_v18 = vor.u32 %v2255_v10, %v1586_v12  ;;  %v2311_v39 = vld [vmem:[#allocation5 + $0x20c] sm:$0xf]  ;;  %v2373_v45 = vld [vmem:[#allocation8 + $0xf4] sm:$0xf0]  ;;  %v1685_v47 = vor.u32 %v2279_v37, %v1682_v38  ;;  %v2000_v37 = vld [vmem:[#allocation8 + $0x90] sm:$0xf] }
  0x5d   :  { %817 = vmatpush.bf16.msra.mxu1 %v1669_v19  ;;  %786 = vmatmul.bf16.vlgmr.msrb.gmra.mxu2 %v2643_v57  ;;  %v1717_v19 = vor.u32 %v2287_v13, %v1714_v14  ;;  %v2355_v52 = vld [vmem:[#allocation8 + $0x64] sm:$0xf0]  ;;  %v2353_v60 = vld [vmem:[#allocation8 + $0x54] sm:$0xf0]  ;;  %v2356_v13 = vld [vmem:[#allocation8 + $0x74] sm:$0xf] }
  0x5e   :  { %830 = vmatpush.bf16.msra.mxu2 %v1797_v20  ;;  %843 = vmatpush.bf16.msra.mxu3 %v1925_v24  ;;  %v1824_v20 = vld [vmem:[#allocation5 + $0x228] sm:$0xf]  ;;  %v1570_v24 = vld [vmem:[#allocation5 + $0x38] sm:$0xf0]  ;;  %v2351_v2 = vld [vmem:[#allocation8 + $0x44] sm:$0xf0] }
  0x5f   :  { %799 = vmatmul.bf16.vlgmr.msrb.gmra.mxu3 %v2645_v58  ;;  %v1825_v29 = vor.u32 %v2317_v21, %v1824_v20  ;;  %v1961_v4 = vor.u32 %v2351_v2, %v1960_v1  ;;  %v2347_v8 = vld [vmem:[#allocation8 + $0x24] sm:$0xf0]  ;;  %v2345_v10 = vld [vmem:[#allocation8 + $0x14] sm:$0xf0]  ;;  %v1986_v14 = vld [vmem:[#allocation8 + $0x78] sm:$0xf0] }
  0x60   :  { %805 = vmatpush.bf16.msra.mxu0 %v1905_v30  ;;  %v1808_v30 = vld [vmem:[#allocation5 + $0x208] sm:$0xf]  ;;  %v2343_v12 = vld [vmem:[#allocation8 + $0x4] sm:$0xf0]  ;;  %v1989_v16 = vor.u32 %v2356_v13, %v1986_v14  ;;  %v2024_v20 = vld [vmem:[#allocation8 + $0xc0] sm:$0xf] }
  0x61   :  { %818 = vmatpush.bf16.msra.mxu1 %v1653_v31  ;;  %v1573_v31 = vor.u32 %v2251_v22, %v1570_v24  ;;  %v2367_v21 = vld [vmem:[#allocation8 + $0xc4] sm:$0xf0]  ;;  %v1970_v24 = vld [vmem:[#allocation8 + $0x58] sm:$0xf0]  ;;  %v2361_v38 = vld [vmem:[#allocation8 + $0x94] sm:$0xf0] }
  0x62   :  { %831 = vmatpush.bf16.msra.mxu2 %v1781_v32  ;;  %844 = vmatpush.bf16.msra.mxu3 %v1909_v36  ;;  %v1701_v32 = vor.u32 %v2283_v25, %v1698_v26  ;;  %v1829_v36 = vor.u32 %v2315_v27, %v1826_v28  ;;  %v2025_v22 = vor.u32 %v2367_v21, %v2024_v20  ;;  %v2016_v26 = vld [vmem:[#allocation8 + $0xb0] sm:$0xf]  ;;  %v2365_v27 = vld [vmem:[#allocation8 + $0xb4] sm:$0xf0]  ;;  %v1930_v1 = vld [vmem:[#allocation8 + $0x8] sm:$0xf0] }
  0x63   :  { %v2017_v28 = vor.u32 %v2365_v27, %v2016_v26  ;;  %v2088_v14 = vld [vmem:[#allocation8 + $0x140] sm:$0xf]  ;;  %v2366_v21 = vld [vmem:[#allocation8 + $0xc4] sm:$0xf]  ;;  %v2381_v26 = vld [vmem:[#allocation8 + $0x134] sm:$0xf0] }
  0x64   :  { %806 = vmatpush.bf16.msra.mxu0 %v1889_v42  ;;  %v2357_v42 = vld [vmem:[#allocation8 + $0x74] sm:$0xf0]  ;;  %v2160_v27 = vld [vmem:[#allocation8 + $0x1d0] sm:$0xf] }
  0x65   :  { %819 = vmatpush.bf16.msra.mxu1 %v1637_v43  ;;  %v1809_v43 = vor.u32 %v2313_v33, %v1808_v30  ;;  %v1985_v49 = vor.u32 %v2357_v42, %v1984_v41  ;;  %v1962_v30 = vld [vmem:[#allocation8 + $0x48] sm:$0xf0]  ;;  %v2363_v33 = vld [vmem:[#allocation8 + $0xa4] sm:$0xf0]  ;;  %v2389_v41 = vld [vmem:[#allocation8 + $0x174] sm:$0xf0] }
  0x66   :  { %832 = vmatpush.bf16.msra.mxu2 %v1765_v44  ;;  %845 = vmatpush.bf16.msra.mxu3 %v1893_v48  ;;  %v2048_v44 = vld [vmem:[#allocation8 + $0xf0] sm:$0xf]  ;;  %v1813_v48 = vor.u32 %v2311_v39, %v1810_v40  ;;  %v2346_v42 = vld [vmem:[#allocation8 + $0x24] sm:$0xf] }
  0x67   :  { %v2049_v53 = vor.u32 %v2373_v45, %v2048_v44  ;;  %v2112_v40 = vld [vmem:[#allocation8 + $0x170] sm:$0xf]  ;;  %v2001_v45 = vor.u32 %v2361_v38, %v2000_v37  ;;  %v2072_v37 = vld [vmem:[#allocation8 + $0x120] sm:$0xf]  ;;  %v2379_v38 = vld [vmem:[#allocation8 + $0x124] sm:$0xf0] }
  0x68   :  { %807 = vmatpush.bf16.msra.mxu0 %v1873_v55  ;;  %v2371_v55 = vld [vmem:[#allocation8 + $0xe4] sm:$0xf0]  ;;  %v2113_v44 = vor.u32 %v2389_v41, %v2112_v40 }
  0x69   :  { %820 = vmatpush.bf16.msra.mxu1 %v1621_v56  ;;  %v1977_v56 = vor.u32 %v2355_v52, %v1976_v50  ;;  %v2041_v61 = vor.u32 %v2371_v55, %v2040_v54  ;;  %v2372_v52 = vld [vmem:[#allocation8 + $0xf4] sm:$0xf] }
  0x6a   :  { %833 = vmatpush.bf16.msra.mxu2 %v1749_v59  ;;  %846 = vmatpush.bf16.msra.mxu3 %v1877_v63  ;;  %v1968_v59 = vld [vmem:[#allocation8 + $0x50] sm:$0xf]  ;;  %v2369_v63 = vld [vmem:[#allocation8 + $0xd4] sm:$0xf0]  ;;  %v2344_v55 = vld [vmem:[#allocation8 + $0x14] sm:$0xf] }
  0x6b   :  { %v1969_v0 = vor.u32 %v2353_v60, %v1968_v59  ;;  %v2033_v3 = vor.u32 %v2369_v63, %v2032_v62  ;;  %v2370_v62 = vld [vmem:[#allocation8 + $0xe4] sm:$0xf]  ;;  %v2042_v63 = vld [vmem:[#allocation8 + $0xe8] sm:$0xf0] }
  0x6c   :  { %808 = vmatpush.bf16.msra.mxu0 %v1857_v5  ;;  %v1952_v5 = vld [vmem:[#allocation8 + $0x30] sm:$0xf]  ;;  %v2045_v2 = vor.u32 %v2370_v62, %v2042_v63  ;;  %v2375_v62 = vld [vmem:[#allocation8 + $0x104] sm:$0xf0]  ;;  %v2136_v63 = vld [vmem:[#allocation8 + $0x1a0] sm:$0xf] }
  0x6d   :  { %821 = vmatpush.bf16.msra.mxu1 %v1605_v6  ;;  %v2349_v6 = vld [vmem:[#allocation8 + $0x34] sm:$0xf0] }
  0x6e   :  { %834 = vmatpush.bf16.msra.mxu2 %v1733_v7  ;;  %847 = vmatpush.bf16.msra.mxu3 %v1861_v11  ;;  %v1953_v7 = vor.u32 %v2349_v6, %v1952_v5  ;;  %v1928_v11 = vld [vmem:[#allocation8] sm:$0xf]  ;;  %v2096_v5 = vld [vmem:[#allocation8 + $0x150] sm:$0xf]  ;;  %v2385_v6 = vld [vmem:[#allocation8 + $0x154] sm:$0xf0] }
  0x6f   :  { %v1929_v15 = vor.u32 %v2343_v12, %v1928_v11 }
  0x70   :  { %809 = vmatpush.bf16.msra.mxu0 %v1841_v17  ;;  %v2354_v17 = vld [vmem:[#allocation8 + $0x64] sm:$0xf] }
  0x71   :  { %822 = vmatpush.bf16.msra.mxu1 %v1589_v18  ;;  %v1978_v18 = vld [vmem:[#allocation8 + $0x68] sm:$0xf0] }
  0x72   :  { %835 = vmatpush.bf16.msra.mxu2 %v1717_v19  ;;  %848 = vmatpush.bf16.msra.mxu3 %v1845_v23  ;;  %v1981_v19 = vor.u32 %v2354_v17, %v1978_v18  ;;  %v2352_v23 = vld [vmem:[#allocation8 + $0x54] sm:$0xf] }
  0x73   :  { %v1973_v25 = vor.u32 %v2352_v23, %v1970_v24 }
  0x74   :  { %810 = vmatpush.bf16.msra.mxu0 %v1825_v29  ;;  %v2350_v29 = vld [vmem:[#allocation8 + $0x44] sm:$0xf] }
  0x75   :  { %823 = vmatpush.bf16.msra.mxu1 %v1573_v31  ;;  %v2008_v31 = vld [vmem:[#allocation8 + $0xa0] sm:$0xf] }
  0x76   :  { %836 = vmatpush.bf16.msra.mxu2 %v1701_v32  ;;  %849 = vmatpush.bf16.msra.mxu3 %v1829_v36  ;;  %v1965_v32 = vor.u32 %v2350_v29, %v1962_v30  ;;  %v2009_v34 = vor.u32 %v2363_v33, %v2008_v31  ;;  %v1954_v36 = vld [vmem:[#allocation8 + $0x38] sm:$0xf0]  ;;  %v2401_v30 = vld [vmem:[#allocation8 + $0x1d4] sm:$0xf0]  ;;  %v2364_v33 = vld [vmem:[#allocation8 + $0xb4] sm:$0xf] }
  0x77   :  { %v1957_v39 = vor.u32 %v2348_v35, %v1954_v36 }
  0x78   :  { %811 = vmatpush.bf16.msra.mxu0 %v1809_v43  ;;  %v1946_v43 = vld [vmem:[#allocation8 + $0x28] sm:$0xf0] }
  0x79   :  { %824 = vmatpush.bf16.msra.mxu1 %v1557_v46  ;;  %v2104_v46 = vld [vmem:[#allocation8 + $0x160] sm:$0xf]  ;;  %v1949_v50 = vor.u32 %v2346_v42, %v1946_v43  ;;  %v2073_v43 = vor.u32 %v2379_v38, %v2072_v37  ;;  %v2082_v38 = vld [vmem:[#allocation8 + $0x138] sm:$0xf0] }
  0x7a   :  { %837 = vmatpush.bf16.msra.mxu2 %v1685_v47  ;;  %850 = vmatpush.bf16.msra.mxu3 %v1813_v48  ;;  %v1992_v47 = vld [vmem:[#allocation8 + $0x80] sm:$0xf]  ;;  %v2359_v48 = vld [vmem:[#allocation8 + $0x84] sm:$0xf0] }
  0x7b   :  { %812 = vmatmul.bf16.vlgmr.msra.gmra.mxu0 %v2641_v51  ;;  %v1993_v59 = vor.u32 %v2359_v48, %v1992_v47  ;;  %v2010_v47 = vld [vmem:[#allocation8 + $0xa8] sm:$0xf0]  ;;  %v2064_v48 = vld [vmem:[#allocation8 + $0x110] sm:$0xf] }
  0x7c   :  { %1254 = vmatpush.bf16.msrb.mxu0 %v1985_v49  ;;  %825 = vmatmul.bf16.vlgmr.msra.gmra.mxu1 %v2643_v57  ;;  %v1944_v57 = vld [vmem:[#allocation8 + $0x20] sm:$0xf]  ;;  %v2387_v49 = vld [vmem:[#allocation8 + $0x164] sm:$0xf0] }
  0x7d   :  { %1267 = vmatpush.bf16.msrb.mxu1 %v2049_v53  ;;  %838 = vmatmul.bf16.vlgmr.msra.gmra.mxu2 %v2645_v58  ;;  %v1945_v58 = vor.u32 %v2347_v8, %v1944_v57  ;;  %v2050_v53 = vld [vmem:[#allocation8 + $0xf8] sm:$0xf0]  ;;  %v2105_v54 = vor.u32 %v2387_v49, %v2104_v46  ;;  %v2097_v8 = vor.u32 %v2385_v6, %v2096_v5  ;;  %v2377_v49 = vld [vmem:[#allocation8 + $0x114] sm:$0xf0]  ;;  %v2358_v6 = vld [vmem:[#allocation8 + $0x84] sm:$0xf] }
  0x7e   :  { %851 = vmatmul.bf16.vlgmr.msra.gmra.mxu3 %v2641_v51  ;;  %v1937_v51 = vor.u32 %v2345_v10, %v1936_v9  ;;  %1280 = vmatpush.bf16.msrb.mxu2 %v2113_v44  ;;  %v2053_v60 = vor.u32 %v2372_v52, %v2050_v53  ;;  %v2368_v10 = vld [vmem:[#allocation8 + $0xd4] sm:$0xf]  ;;  %v2399_v44 = vld [vmem:[#allocation8 + $0x1c4] sm:$0xf0]  ;;  %v2144_v53 = vld [vmem:[#allocation8 + $0x1b0] sm:$0xf] }
  0x7f   :  { %v2114_v5 = vld [vmem:[#allocation8 + $0x178] sm:$0xf0] }
  0x80   :  { %1255 = vmatpush.bf16.msrb.mxu0 %v1977_v56  ;;  %v1938_v56 = vld [vmem:[#allocation8 + $0x18] sm:$0xf0] }
  0x81   :  { %1268 = vmatpush.bf16.msrb.mxu1 %v2041_v61  ;;  %v1941_v61 = vor.u32 %v2344_v55, %v1938_v56  ;;  %v2360_v55 = vld [vmem:[#allocation8 + $0x94] sm:$0xf]  ;;  %v2065_v56 = vor.u32 %v2377_v49, %v2064_v48  ;;  %v2378_v48 = vld [vmem:[#allocation8 + $0x124] sm:$0xf]  ;;  %v2074_v49 = vld [vmem:[#allocation8 + $0x128] sm:$0xf0] }
  0x82   :  { %1281 = vmatpush.bf16.msrb.mxu2 %v2105_v54  ;;  %v2397_v54 = vld [vmem:[#allocation8 + $0x1b4] sm:$0xf0] }
  0x84   :  { %1256 = vmatpush.bf16.msrb.mxu0 %v1969_v0  ;;  %v2342_v0 = vld [vmem:[#allocation8 + $0x4] sm:$0xf] }
  0x85   :  { %1269 = vmatpush.bf16.msrb.mxu1 %v2033_v3  ;;  %v2659_v3 = vld [vmem:[#allocation7] sm:$0xf] }
  0x86   :  { %v212_v57 = vperm.slane %v2659_v3, 0  ;;  %1282 = vmatpush.bf16.msrb.mxu2 %v2097_v8 }
  0x88   :  { %1257 = vmatpush.bf16.msrb.mxu0 %v1961_v4  ;;  %v1933_v4 = vor.u32 %v2342_v0, %v1930_v1 }
  0x89   :  { %1270 = vmatpush.bf16.msrb.mxu1 %v2025_v22  ;;  %v2026_v22 = vld [vmem:[#allocation8 + $0xc8] sm:$0xf0] }
  0x8a   :  { %v2029_v24 = vor.u32 %v2366_v21, %v2026_v22  ;;  %v2098_v21 = vld [vmem:[#allocation8 + $0x158] sm:$0xf0]  ;;  %v2404_v22 = vld [vmem:[#allocation8 + $0x1f4] sm:$0xf] }
  0x8c   :  { %1258 = vmatpush.bf16.msrb.mxu0 %v1953_v7  ;;  %v2176_v7 = vld [vmem:[#allocation8 + $0x1f0] sm:$0xf] }
  0x8d   :  { %1271 = vmatpush.bf16.msrb.mxu1 %v2017_v28 }
  0x90   :  { %1259 = vmatpush.bf16.msrb.mxu0 %v1945_v58  ;;  %v2405_v58 = vld [vmem:[#allocation8 + $0x1f4] sm:$0xf0] }
  0x91   :  { %1272 = vmatpush.bf16.msrb.mxu1 %v2009_v34  ;;  %v2177_v9 = vor.u32 %v2405_v58, %v2176_v7  ;;  %v2018_v34 = vld [vmem:[#allocation8 + $0xb8] sm:$0xf0]  ;;  %v1994_v7 = vld [vmem:[#allocation8 + $0x88] sm:$0xf0] }
  0x92   :  { %v2021_v36 = vor.u32 %v2364_v33, %v2018_v34  ;;  %v2170_v34 = vld [vmem:[#allocation8 + $0x1e8] sm:$0xf0] }
  0x93   :  { %1293 = vmatpush.bf16.msrb.mxu3 %v2177_v9 }
  0x94   :  { %1260 = vmatpush.bf16.msrb.mxu0 %v1937_v51  ;;  %v2034_v51 = vld [vmem:[#allocation8 + $0xd8] sm:$0xf0] }
  0x95   :  { %1273 = vmatpush.bf16.msrb.mxu1 %v2001_v45  ;;  %v2037_v11 = vor.u32 %v2368_v10, %v2034_v51  ;;  %v2362_v45 = vld [vmem:[#allocation8 + $0xa4] sm:$0xf]  ;;  %v1997_v10 = vor.u32 %v2358_v6, %v1994_v7  ;;  %v2128_v51 = vld [vmem:[#allocation8 + $0x190] sm:$0xf] }
  0x96   :  { %v2013_v52 = vor.u32 %v2362_v45, %v2010_v47 }
  0x98   :  { %1261 = vmatpush.bf16.msrb.mxu0 %v1929_v15  ;;  %v2383_v15 = vld [vmem:[#allocation8 + $0x144] sm:$0xf0] }
  0x99   :  { %1274 = vmatpush.bf16.msrb.mxu1 %v1993_v59  ;;  %v2089_v18 = vor.u32 %v2383_v15, %v2088_v14  ;;  %v2002_v59 = vld [vmem:[#allocation8 + $0x98] sm:$0xf0]  ;;  %v2106_v14 = vld [vmem:[#allocation8 + $0x168] sm:$0xf0]  ;;  %v213_v15 = vperm.slane %v2659_v3, 1 }
  0x9a   :  { %v2005_v1 = vor.u32 %v2360_v55, %v2002_v59  ;;  %v2066_v59 = vld [vmem:[#allocation8 + $0x118] sm:$0xf0] }
  0x9b   :  { %1283 = vmatpush.bf16.msrb.mxu2 %v2089_v18  ;;  %v2391_v18 = vld [vmem:[#allocation8 + $0x184] sm:$0xf0] }
  0x9c   :  { %1306 = vmatpush.bf16.msra.mxu0 %v1989_v16  ;;  %v2168_v16 = vld [vmem:[#allocation8 + $0x1e0] sm:$0xf] }
  0x9d   :  { %1319 = vmatpush.bf16.msra.mxu1 %v2053_v60  ;;  %v2145_v60 = vor.u32 %v2397_v54, %v2144_v53  ;;  %v2077_v53 = vor.u32 %v2378_v48, %v2074_v49  ;;  %v2154_v54 = vld [vmem:[#allocation8 + $0x1c8] sm:$0xf0]  ;;  %v2418_v48 = vld [vmem:[#allocation10 + $0x60] sm:$0xff] }
  0xa0   :  { %1307 = vmatpush.bf16.msra.mxu0 %v1981_v19  ;;  %v2403_v19 = vld [vmem:[#allocation8 + $0x1e4] sm:$0xf0] }
  0xa1   :  { %1320 = vmatpush.bf16.msra.mxu1 %v2045_v2  ;;  %v2169_v20 = vor.u32 %v2403_v19, %v2168_v16  ;;  %v2395_v2 = vld [vmem:[#allocation8 + $0x1a4] sm:$0xf0] }
  0xa2   :  { %v2137_v58 = vor.u32 %v2395_v2, %v2136_v63  ;;  %v2374_v63 = vld [vmem:[#allocation8 + $0x104] sm:$0xf] }
  0xa3   :  { %1294 = vmatpush.bf16.msrb.mxu3 %v2169_v20  ;;  %v2384_v20 = vld [vmem:[#allocation8 + $0x154] sm:$0xf]  ;;  %v2394_v2 = vld [vmem:[#allocation8 + $0x1a4] sm:$0xf] }
  0xa4   :  { %1308 = vmatpush.bf16.msra.mxu0 %v1973_v25  ;;  %v2080_v25 = vld [vmem:[#allocation8 + $0x130] sm:$0xf] }
  0xa5   :  { %1321 = vmatpush.bf16.msra.mxu1 %v2037_v11  ;;  %v2081_v29 = vor.u32 %v2381_v26, %v2080_v25  ;;  %v2393_v11 = vld [vmem:[#allocation8 + $0x194] sm:$0xf0]  ;;  %v2178_v25 = vld [vmem:[#allocation8 + $0x1f8] sm:$0xf0] }
  0xa6   :  { %v2181_v26 = vor.u32 %v2404_v22, %v2178_v25 }
  0xa7   :  { %1284 = vmatpush.bf16.msrb.mxu2 %v2081_v29  ;;  %v2090_v29 = vld [vmem:[#allocation8 + $0x148] sm:$0xf0] }
  0xa8   :  { %1309 = vmatpush.bf16.msra.mxu0 %v1965_v32  ;;  %v2161_v32 = vor.u32 %v2401_v30, %v2160_v27  ;;  %v2402_v30 = vld [vmem:[#allocation8 + $0x1e4] sm:$0xf] }
  0xa9   :  { %1322 = vmatpush.bf16.msra.mxu1 %v2029_v24  ;;  %v2101_v24 = vor.u32 %v2384_v20, %v2098_v21 }
  0xaa   :  { %1295 = vmatpush.bf16.msrb.mxu3 %v2161_v32 }
  0xab   :  { %1285 = vmatpush.bf16.msrb.mxu2 %v2073_v43 }
  0xac   :  { %1310 = vmatpush.bf16.msra.mxu0 %v1957_v39  ;;  %v2152_v39 = vld [vmem:[#allocation8 + $0x1c0] sm:$0xf] }
  0xad   :  { %1323 = vmatpush.bf16.msra.mxu1 %v2021_v36  ;;  %v2153_v46 = vor.u32 %v2399_v44, %v2152_v39  ;;  %v2173_v36 = vor.u32 %v2402_v30, %v2170_v34  ;;  %v2400_v39 = vld [vmem:[#allocation8 + $0x1d4] sm:$0xf] }
  0xae   :  { %v2412_v34 = vld [vmem:[#allocation10 + $0x30] sm:$0xff] }
  0xaf   :  { %1296 = vmatpush.bf16.msrb.mxu3 %v2153_v46  ;;  %1286 = vmatpush.bf16.msrb.mxu2 %v2065_v56  ;;  %v2376_v56 = vld [vmem:[#allocation8 + $0x114] sm:$0xf] }
  0xb0   :  { %1311 = vmatpush.bf16.msra.mxu0 %v1949_v50 }
  0xb1   :  { %1324 = vmatpush.bf16.msra.mxu1 %v2013_v52 }
  0xb3   :  { %1297 = vmatpush.bf16.msrb.mxu3 %v2145_v60  ;;  %v2396_v60 = vld [vmem:[#allocation8 + $0x1b4] sm:$0xf] }
  0xb4   :  { %1312 = vmatpush.bf16.msra.mxu0 %v1941_v61  ;;  %v2056_v61 = vld [vmem:[#allocation8 + $0x100] sm:$0xf] }
  0xb5   :  { %v2057_v8 = vor.u32 %v2375_v62, %v2056_v61  ;;  %1325 = vmatpush.bf16.msra.mxu1 %v2005_v1  ;;  %v2069_v61 = vor.u32 %v2376_v56, %v2066_v59  ;;  %v2146_v62 = vld [vmem:[#allocation8 + $0x1b8] sm:$0xf0]  ;;  %v2414_v56 = vld [vmem:[#allocation10 + $0x40] sm:$0xff] }
  0xb6   :  { %v2149_v1 = vor.u32 %v2396_v60, %v2146_v62 }
  0xb7   :  { %1287 = vmatpush.bf16.msrb.mxu2 %v2057_v8  ;;  %1298 = vmatpush.bf16.msrb.mxu3 %v2137_v58  ;;  %v214_v8 = vperm.slane %v2659_v3, 2  ;;  %v2392_v58 = vld [vmem:[#allocation8 + $0x194] sm:$0xf] }
  0xb8   :  { %1313 = vmatpush.bf16.msra.mxu0 %v1933_v4  ;;  %v709_v12 = vpop.f32.mrf.mxu0  ;;  %v2388_v4 = vld [vmem:[#allocation8 + $0x174] sm:$0xf] }
  0xb9   :  { %v722_v13 = vpop.f32.mrf.mxu1  ;;  %v710_v17 = vadd.f32 %v709_v12, %v212_v57  ;;  %v2117_v9 = vor.u32 %v2388_v4, %v2114_v5  ;;  %v2129_v12 = vor.u32 %v2393_v11, %v2128_v51  ;;  %1326 = vmatpush.bf16.msra.mxu1 %v1997_v10  ;;  %v2138_v4 = vld [vmem:[#allocation8 + $0x1a8] sm:$0xf0]  ;;  %v2390_v51 = vld [vmem:[#allocation8 + $0x184] sm:$0xf] }
  0xba   :  { %v2122_v11 = vld [vmem:[#allocation8 + $0x188] sm:$0xf0] }
  0xbb   :  { %v723_v23 = vadd.f32 %v722_v13, %v710_v17  ;;  %1332 = vmatpush.bf16.msra.mxu2 %v2117_v9  ;;  %v2386_v13 = vld [vmem:[#allocation8 + $0x164] sm:$0xf]  ;;  %v2120_v17 = vld [vmem:[#allocation8 + $0x180] sm:$0xf]  ;;  %1299 = vmatpush.bf16.msrb.mxu3 %v2129_v12  ;;  %v2130_v9 = vld [vmem:[#allocation8 + $0x198] sm:$0xf0] }
  0xbc   :  { %v2109_v16 = vor.u32 %v2386_v13, %v2106_v14  ;;  %v2121_v19 = vor.u32 %v2391_v18, %v2120_v17  ;;  %v2133_v10 = vor.u32 %v2392_v58, %v2130_v9  ;;  %v2125_v13 = vor.u32 %v2390_v51, %v2122_v11 }
  0xbf   :  { %1333 = vmatpush.bf16.msra.mxu2 %v2109_v16  ;;  %1300 = vmatpush.bf16.msrb.mxu3 %v2121_v19  ;;  %v215_v16 = vperm.slane %v2659_v3, 3 }
  0xc0   :  { %v735_v28 = vpop.f32.mrf.mxu2  ;;  %v711_v41 = vpop.f32.mrf.mxu0 }
  0xc1   :  { %v736_v31 = vadd.f32 %v735_v28, %v723_v23  ;;  %v724_v42 = vpop.f32.mrf.mxu1  ;;  %v2382_v28 = vld [vmem:[#allocation8 + $0x144] sm:$0xf] }
  0xc2   :  { %v2662_v35 = vpop.f32.mrf.mxu3  ;;  %v2093_v33 = vor.u32 %v2382_v28, %v2090_v29  ;;  %v2162_v42 = vld [vmem:[#allocation8 + $0x1d8] sm:$0xf0] }
  0xc3   :  { %v856_v40 = vmax.f32 %v736_v31, 0.0  ;;  %v749_v23 = vadd.f32 %v2662_v35, %v213_v15  ;;  %1334 = vmatpush.bf16.msra.mxu2 %v2101_v24  ;;  %1345 = vmatpush.bf16.msra.mxu3 %v2181_v26  ;;  %v2380_v35 = vld [vmem:[#allocation8 + $0x134] sm:$0xf]  ;;  %v2165_v43 = vor.u32 %v2400_v39, %v2162_v42 }
  0xc4   :  { %v2085_v41 = vor.u32 %v2380_v35, %v2082_v38  ;;  %v2410_v35 = vld [vmem:[#allocation10 + $0x20] sm:$0xff]  ;;  %v2408_v42 = vld [vmem:[#allocation10 + $0x10] sm:$0xff] }
  0xc5   :  { %v860_v50 = vpack.c.bf16 %v856_v40, %v856_v40 }
  0xc7   :  { %1262 = vmatmul.bf16.vlgmr.msrb.gmra.mxu0 %v860_v50  ;;  %1335 = vmatpush.bf16.msra.mxu2 %v2093_v33  ;;  %v2413_v33 = vld [vmem:[#allocation10 + $0x38] sm:$0xff] }
  0xc8   :  { %v737_v0 = vpop.f32.mrf.mxu2  ;;  %1346 = vmatpush.bf16.msra.mxu3 %v2173_v36  ;;  %1494 = vmatpush.bf16.msrb.mxu0 %v2413_v33 }
  0xc9   :  { %v2058_v0 = vld [vmem:[#allocation8 + $0x108] sm:$0xf0] }
  0xca   :  { %v750_v57 = vpop.f32.mrf.mxu3  ;;  %v2061_v7 = vor.u32 %v2374_v63, %v2058_v0 }
  0xcb   :  { %1336 = vmatpush.bf16.msra.mxu2 %v2085_v41  ;;  %v2141_v57 = vor.u32 %v2394_v2, %v2138_v4  ;;  %v2421_v41 = vld [vmem:[#allocation10 + $0x78] sm:$0xff] }
  0xcc   :  { %1347 = vmatpush.bf16.msra.mxu3 %v2165_v43  ;;  %1495 = vmatpush.bf16.msrb.mxu0 %v2412_v34  ;;  %v2420_v43 = vld [vmem:[#allocation10 + $0x70] sm:$0xff] }
  0xcf   :  { %1337 = vmatpush.bf16.msra.mxu2 %v2077_v53 }
  0xd3   :  { %1338 = vmatpush.bf16.msra.mxu2 %v2069_v61 }
  0xd7   :  { %1314 = vmatmul.bf16.vlgmr.msra.gmra.mxu0 %v860_v50  ;;  %v2398_v50 = vld [vmem:[#allocation8 + $0x1c4] sm:$0xf]  ;;  %1339 = vmatpush.bf16.msra.mxu2 %v2061_v7 }
  0xd8   :  { %v761_v27 = vpop.f32.mrf.mxu0  ;;  %v2157_v55 = vor.u32 %v2398_v50, %v2154_v54  ;;  %v2417_v50 = vld [vmem:[#allocation10 + $0x58] sm:$0xff]  ;;  %v2415_v54 = vld [vmem:[#allocation10 + $0x48] sm:$0xff] }
  0xd9   :  { %v762_v31 = vadd.f32 %v761_v27, %v749_v23  ;;  %v774_v32 = vpop.f32.mrf.mxu1 }
  0xda   :  { %1348 = vmatpush.bf16.msra.mxu3 %v2157_v55  ;;  %v928_v55 = vld [vmem:[%s2684_s4] sm:$0x3] }
  0xdb   :  { %v775_v37 = vadd.f32 %v774_v32, %v762_v31  ;;  %v930_v59 = vperm.slane %v928_v55, 0 }
  0xdd   :  { %v857_v40 = vmax.f32 %v775_v37, 0.0  ;;  %v2411_v37 = vld [vmem:[#allocation10 + $0x28] sm:$0xff] }
  0xde   :  { %1349 = vmatpush.bf16.msra.mxu3 %v2149_v1  ;;  %1496 = vmatpush.bf16.msrb.mxu0 %v2411_v37 }
  0xdf   :  { %v861_v44 = vpack.c.bf16 %v857_v40, %v857_v40  ;;  %v2409_v40 = vld [vmem:[#allocation10 + $0x18] sm:$0xff] }
  0xe0   :  { %v787_v45 = vpop.f32.mrf.mxu2  ;;  %v763_v47 = vpop.f32.mrf.mxu0 }
  0xe1   :  { %1275 = vmatmul.bf16.vlgmr.msrb.gmra.mxu1 %v861_v44  ;;  %v776_v52 = vpop.f32.mrf.mxu1  ;;  %v788_v12 = vadd.f32 %v787_v45, %v214_v8  ;;  %v2407_v45 = vld [vmem:[#allocation10 + $0x8] sm:$0xff]  ;;  %v2406_v47 = vld [vmem:[#allocation10] sm:$0xff] }
  0xe2   :  { %v800_v46 = vpop.f32.mrf.mxu3  ;;  %1350 = vmatpush.bf16.msra.mxu3 %v2141_v57  ;;  %1497 = vmatpush.bf16.msrb.mxu0 %v2410_v35  ;;  %v2416_v52 = vld [vmem:[#allocation10 + $0x50] sm:$0xff] }
  0xe3   :  { %v801_v14 = vadd.f32 %v800_v46, %v788_v12  ;;  %1507 = vmatpush.bf16.msrb.mxu1 %v2421_v41  ;;  %v2419_v46 = vld [vmem:[#allocation10 + $0x68] sm:$0xff] }
  0xe6   :  { %1351 = vmatpush.bf16.msra.mxu3 %v2133_v10  ;;  %1498 = vmatpush.bf16.msrb.mxu0 %v2409_v40 }
  0xe7   :  { %1508 = vmatpush.bf16.msrb.mxu1 %v2420_v43 }
  0xe8   :  { %v789_v5 = vpop.f32.mrf.mxu2 }
  0xea   :  { %v802_v6 = vpop.f32.mrf.mxu3  ;;  %1352 = vmatpush.bf16.msra.mxu3 %v2125_v13  ;;  %1499 = vmatpush.bf16.msrb.mxu0 %v2408_v42 }
  0xeb   :  { %1509 = vmatpush.bf16.msrb.mxu1 %v2419_v46  ;;  %v931_v6 = vperm.slane %v928_v55, 1 }
  0xee   :  { %1500 = vmatpush.bf16.msrb.mxu0 %v2407_v45 }
  0xef   :  { %1510 = vmatpush.bf16.msrb.mxu1 %v2418_v48 }
  0xf1   :  { %1327 = vmatmul.bf16.vlgmr.msra.gmra.mxu1 %v861_v44 }
  0xf2   :  { %1501 = vmatpush.bf16.msrb.mxu0 %v2406_v47 }
  0xf3   :  { %1511 = vmatpush.bf16.msrb.mxu1 %v2417_v50 }
  0xf7   :  { %1512 = vmatpush.bf16.msrb.mxu1 %v2416_v52 }
  0xf8   :  { %v813_v15 = vpop.f32.mrf.mxu0 }
  0xf9   :  { %v814_v17 = vadd.f32 %v813_v15, %v801_v14  ;;  %v826_v18 = vpop.f32.mrf.mxu1 }
  0xfa   :  { %v827_v20 = vadd.f32 %v826_v18, %v215_v16 }
  0xfb   :  { %v858_v19 = vmax.f32 %v814_v17, 0.0  ;;  %1513 = vmatpush.bf16.msrb.mxu1 %v2415_v54  ;;  %v2433_v17 = vld [vmem:[%s2686_s6] ss:$0 sm:$0xff] }
  0xfd   :  { %v862_v21 = vpack.c.bf16 %v858_v19, %v858_v19 }
  0xff   :  { %1288 = vmatmul.bf16.vlgmr.msrb.gmra.mxu2 %v862_v21  ;;  %1514 = vmatpush.bf16.msrb.mxu1 %v2414_v56 }
 0x100   :  { %v839_v22 = vpop.f32.mrf.mxu2  ;;  %v815_v25 = vpop.f32.mrf.mxu0 }
 0x101   :  { %v840_v23 = vadd.f32 %v839_v22, %v827_v20  ;;  %v852_v24 = vpop.f32.mrf.mxu3  ;;  %v828_v26 = vpop.f32.mrf.mxu1  ;;  %v2435_v25 = vld [vmem:[#allocation2] ss:$0 sm:$0xff] }
 0x103   :  { %v853_v27 = vadd.f32 %v852_v24, %v840_v23 }
 0x105   :  { %v859_v28 = vmax.f32 %v853_v27, 0.0 }
 0x107   :  { %v863_v29 = vpack.c.bf16 %v859_v28, %v859_v28 }
 0x108   :  { %v841_v30 = vpop.f32.mrf.mxu2 }
 0x109   :  { %v854_v31 = vpop.f32.mrf.mxu3  ;;  %1301 = vmatmul.bf16.vlgmr.msrb.gmra.mxu3 %v863_v29 }
 0x10f   :  { %1340 = vmatmul.bf16.vlgmr.msra.gmra.mxu2 %v862_v21  ;;  %v2434_v21 = vld [vmem:[%s2687_s7] ss:$0 sm:$0xff] }
 0x119   :  { %1353 = vmatmul.bf16.vlgmr.msra.gmra.mxu3 %v863_v29 }
 0x144   :  { %v1263_v3 = vpop.f32.mrf.mxu0 }
 0x145   :  { %v1264_v61 = vadd.f32 %v1263_v3, %v930_v59 }
 0x14c   :  { %v1265_v32 = vpop.f32.mrf.mxu0 }
 0x154   :  { %v1315_v36 = vpop.f32.mrf.mxu0 }
 0x155   :  { %v1316_v8 = vadd.f32 %v1315_v36, %v931_v6 }
 0x15c   :  { %v1317_v38 = vpop.f32.mrf.mxu0 }
 0x15e   :  { %v1276_v39 = vpop.f32.mrf.mxu1 }
 0x15f   :  { %v1277_v62 = vadd.f32 %v1276_v39, %v1264_v61 }
 0x166   :  { %v1278_v44 = vpop.f32.mrf.mxu1 }
 0x16e   :  { %v1328_v49 = vpop.f32.mrf.mxu1 }
 0x16f   :  { %v1329_v58 = vadd.f32 %v1328_v49, %v1316_v8 }
 0x176   :  { %v1330_v53 = vpop.f32.mrf.mxu1 }
 0x182   :  { %v1289_v60 = vpop.f32.mrf.mxu2 }
 0x183   :  { %v1290_v63 = vadd.f32 %v1289_v60, %v1277_v62 }
 0x18a   :  { %v1291_v0 = vpop.f32.mrf.mxu2 }
 0x18c   :  { %v1302_v1 = vpop.f32.mrf.mxu3 }
 0x18d   :  { %v1303_v2 = vadd.f32 %v1302_v1, %v1290_v63 }
 0x18f   :  { %v1358_v4 = vmax.f32 %v1303_v2, 0.0 }
 0x191   :  { %v1360_v5 = vpack.c.bf16 %v1358_v4, %v1358_v4 }
 0x192   :  { %v1341_v7 = vpop.f32.mrf.mxu2 }
 0x193   :  { %1502 = vmatmul.bf16.vlgmr.msrb.gmra.mxu0 %v1360_v5  ;;  %v1342_v9 = vadd.f32 %v1341_v7, %v1329_v58 }
 0x194   :  { %v1304_v57 = vpop.f32.mrf.mxu3 }
 0x19a   :  { %v1343_v10 = vpop.f32.mrf.mxu2 }
 0x19c   :  { %v1354_v51 = vpop.f32.mrf.mxu3 }
 0x19d   :  { %v1355_v11 = vadd.f32 %v1354_v51, %v1342_v9 }
 0x19f   :  { %v1359_v12 = vmax.f32 %v1355_v11, 0.0 }
 0x1a1   :  { %v1361_v13 = vpack.c.bf16 %v1359_v12, %v1359_v12 }
 0x1a3   :  { %1515 = vmatmul.bf16.vlgmr.msrb.gmra.mxu1 %v1361_v13 }
 0x1a4   :  { %v1356_v14 = vpop.f32.mrf.mxu3 }
 0x210   :  { %v1503_v15 = vpop.f32.mrf.mxu0 }
 0x211   :  { %v1504_v18 = vadd.f32 %v2433_v17, %v1503_v15 }
 0x218   :  { %v1505_v16 = vpop.f32.mrf.mxu0 }
 0x220   :  { %v1516_v19 = vpop.f32.mrf.mxu1 }
 0x221   :  { %v1517_v20 = vadd.f32 %v1516_v19, %v1504_v18 }
 0x223   :  { %v1520_v22 = vmax.f32 %v1517_v20, 0.0 }
 0x225   :  { %v1525_v23 = vmul.f32 %v2434_v21, %v1520_v22 }
 0x227   :  { %1526 = vadd.xlane.f32.xlu0 %v1525_v23 }
 0x228   :  { %v1518_v24 = vpop.f32.mrf.mxu1 }
 0x29a   :  { %v1527_v26 = vpop.xlane.xlu0 %1526 }
 0x29b   :  { %v1532_v27 = vadd.f32 %v2435_v25, %v1527_v26 }
 0x29d   :  { %1534 = vst.msk [vmem:[%s2689_s9] sm:$0xff] %vm1533_vm0, %v1532_v27 }
 0x29e   :  { %1539 = vsyncpa [#allocation4], 1 }
 0x29f   :  { %1540 = vsyncpa [#allocation6], 1 }
 0x2a0   :  { %1541 = vsyncpa [#allocation9], 1 }

</bundles_post_ra>
